<compile_context>
chip_gen: v6e
topology: v6e:2x2x1
jax: 0.10.0
libtpu: 0.0.40
codegen_flags: <defaults>
</compile_context>

<pallas_src>
import functools

import jax
import jax.numpy as jnp
from jax.experimental import pallas as pl
from jax.experimental.pallas import tpu as pltpu

LANES = 128
SUBLANES = 8
NUM_SPLITS = 2   # leading "parallel" grid axis (per-TensorCore split on multi-TC chips)


def _sublane_multiple(dtype):
    # Second-to-last block dim must be a multiple of 8 (32-bit dtypes),
    # 16 (16-bit) or 32 (8-bit).
    itemsize = jnp.dtype(dtype).itemsize
    return SUBLANES * max(1, 4 // max(1, itemsize))


def _tile_config():
    """Generation-aware (max_tile_rows, vmem_limit_bytes)."""
    vmem_cap = None
    try:
        info = pltpu.get_tpu_info()
        for name in ("vmem_capacity_bytes", "vmem_size_bytes", "vmem_bytes"):
            val = getattr(info, name, None)
            if val:
                vmem_cap = int(val)
                break
    except Exception:
        vmem_cap = None
    if vmem_cap is not None and vmem_cap >= 100 * 1024 * 1024:
        # v5e / v6e (128 MiB physical VMEM): 8 MiB f32 blocks per input per
        # pipeline buffer (2 inputs x 2 buffers = 32 MiB) under a 64 MiB limit.
        return 16384, 64 * 1024 * 1024
    # v7x (64 MiB physical VMEM) or unknown: 4 MiB blocks, 40 MiB limit keeps
    # double-buffering intact with headroom.
    return 8192, 40 * 1024 * 1024


def _dice_kernel(pred_ref, label_ref, out_ref, *, apply_sigmoid, tile_rows,
                 num_splits, total_blocks, valid_rows_last, has_partial,
                 has_phantom):
    c = pl.program_id(0)   # parallel split (one per TensorCore on multi-TC chips)
    i = pl.program_id(1)   # sequential reduction steps within the split

    # Zero this split's partial-sum accumulators at the start of its reduction.
    @pl.when(i == 0)
    def _init():
        out_ref[...] = jnp.zeros_like(out_ref)

    block_idx = i * num_splits + c
    g = tile_rows // SUBLANES

    def accumulate(valid_rows):
        p = pred_ref[...].astype(jnp.float32)
        l = label_ref[...].astype(jnp.float32)
        if apply_sigmoid:
            # sigmoid(x) = 1 / (1 + exp(-x)): exp on the EUP plus a single
            # approximate-reciprocal push instead of an exact divide sequence.
            p = pl.reciprocal(1.0 + jnp.exp(-p), approx=True)
        if valid_rows is not None:
            # Only compiled into the last-real-block branch; `valid_rows` is a
            # small Python int, so this is one iota + compare + two selects.
            row_ids = jax.lax.broadcasted_iota(jnp.int32, p.shape, 0)
            keep = row_ids < valid_rows
            p = jnp.where(keep, p, 0.0)
            l = jnp.where(keep, l, 0.0)
        # Pure-VPU partial sums: fold the (tile_rows, 128) tile down to one
        # (8, 128) vreg per quantity; the cross-lane reduction is deferred to a
        # single tiny wrapper-side jnp.sum.
        out_ref[0, 0, :, :] += jnp.sum((p * l).reshape(g, SUBLANES, LANES), axis=0)
        out_ref[0, 1, :, :] += jnp.sum((p + l).reshape(g, SUBLANES, LANES), axis=0)

    last = total_blocks - 1
    if has_partial:
        # Interior blocks take the unmasked fast path; only the single ragged
        # last block is masked; phantom blocks (block_idx > last) are skipped.
        @pl.when(block_idx < last)
        def _full():
            accumulate(None)

        @pl.when(block_idx == last)
        def _masked():
            accumulate(valid_rows_last)
    elif has_phantom:
        @pl.when(block_idx < total_blocks)
        def _real():
            accumulate(None)
    else:
        accumulate(None)


def dice_loss(prediction, label, smooth=1.0, used_sigmoid_actFun=False,
              *, _max_tile_rows=None):
    """Pallas TPU implementation of DiceLoss.forward (any input shape/dtype)."""
    apply_sigmoid = not used_sigmoid_actFun

    pred_flat = prediction.reshape(-1)
    label_flat = label.reshape(-1)
    if pred_flat.dtype == jnp.bool_:
        pred_flat = pred_flat.astype(jnp.int8)
    if label_flat.dtype == jnp.bool_:
        label_flat = label_flat.astype(jnp.int8)
    n = int(pred_flat.shape[0])

    # Row alignment required by the BlockSpecs for the narrower input dtype.
    row_mult = max(_sublane_multiple(pred_flat.dtype),
                   _sublane_multiple(label_flat.dtype))
    chunk = row_mult * LANES
    main = (n // chunk) * chunk          # aligned prefix handled by the kernel
    rows = main // LANES

    # Ragged tail (< chunk elements): tiny wrapper-side sums.  No full-array
    # jnp.pad — the kernel never sees (nor masks) the tail.
    tail_inter = jnp.float32(0.0)
    tail_denom = jnp.float32(0.0)
    if main != n:
        p_tail = pred_flat[main:].astype(jnp.float32)
        l_tail = label_flat[main:].astype(jnp.float32)
        if apply_sigmoid:
            p_tail = jax.nn.sigmoid(p_tail)
        tail_inter = jnp.sum(p_tail * l_tail)
        tail_denom = jnp.sum(p_tail) + jnp.sum(l_tail)

    if rows == 0:
        inter, denom = tail_inter, tail_denom
    else:
        pred2d = (pred_flat if main == n else pred_flat[:main]).reshape(rows, LANES)
        label2d = (label_flat if main == n else label_flat[:main]).reshape(rows, LANES)

        default_tile_rows, vmem_limit = _tile_config()
        max_tile_rows = default_tile_rows if _max_tile_rows is None else _max_tile_rows
        max_tile_rows = max(row_mult, (max_tile_rows // row_mult) * row_mult)
        tile_rows = min(max_tile_rows, rows)           # multiple of row_mult

        total_blocks = -(-rows // tile_rows)
        num_splits = min(NUM_SPLITS, total_blocks)     # avoid all-phantom splits
        inner_steps = -(-total_blocks // num_splits)
        has_partial = (rows % tile_rows) != 0
        has_phantom = inner_steps * num_splits != total_blocks
        valid_rows_last = rows - (total_blocks - 1) * tile_rows

        if has_phantom:
            def in_map(c, i):
                # Clamp phantom trailing blocks so their DMA stays in bounds
                # (their contribution is skipped in-kernel).
                return (jnp.minimum(i * num_splits + c, total_blocks - 1), 0)
        else:
            def in_map(c, i):
                return (i * num_splits + c, 0)

        kernel = functools.partial(
            _dice_kernel,
            apply_sigmoid=apply_sigmoid,
            tile_rows=tile_rows,
            num_splits=num_splits,
            total_blocks=total_blocks,
            valid_rows_last=valid_rows_last,
            has_partial=has_partial,
            has_phantom=has_phantom,
        )

        partials = pl.pallas_call(
            kernel,
            out_shape=jax.ShapeDtypeStruct((num_splits, 2, SUBLANES, LANES),
                                           jnp.float32),
            grid_spec=pltpu.PrefetchScalarGridSpec(
                num_scalar_prefetch=0,
                grid=(num_splits, inner_steps),
                in_specs=[
                    pl.BlockSpec((tile_rows, LANES), in_map),
                    pl.BlockSpec((tile_rows, LANES), in_map),
                ],
                out_specs=pl.BlockSpec((1, 2, SUBLANES, LANES),
                                       lambda c, i: (c, 0, 0, 0)),
            ),
            compiler_params=pltpu.CompilerParams(
                dimension_semantics=("parallel", "arbitrary"),
                vmem_limit_bytes=vmem_limit,
            ),
        )(pred2d, label2d)

        # Final cross-lane reduction on 2048 floats: trivial.
        sums = jnp.sum(partials, axis=(0, 2, 3))       # (2,): inter, sum(p)+sum(l)
        inter = sums[0] + tail_inter
        denom = sums[1] + tail_denom

    smooth = jnp.float32(smooth)
    return 1.0 - (2.0 * inter + smooth) / (denom + smooth)


def dice_loss_ref(prediction, label, smooth=1.0, used_sigmoid_actFun=False):
    p = prediction.reshape(-1).astype(jnp.float32)
    if not used_sigmoid_actFun:
        p = jax.nn.sigmoid(p)
    l = label.reshape(-1).astype(jnp.float32)
    inter = jnp.sum(p * l)
    return 1.0 - (2.0 * inter + smooth) / (jnp.sum(p) + jnp.sum(l) + smooth)


if __name__ == "__main__":
    key = jax.random.PRNGKey(0)

    # 1) Primary case: NCHW logits + binary mask with in-kernel sigmoid.
    #    Loose tolerance because the kernel uses the EUP approximate
    #    reciprocal; structural correctness is verified tightly below.
    k1, k2 = jax.random.split(key)
    x = jax.random.normal(k1, (2, 4, 16, 16), dtype=jnp.float32)
    y = (jax.random.uniform(k2, (2, 4, 16, 16)) > 0.5).astype(jnp.float32)
    loss = jax.block_until_ready(dice_loss(x, y, smooth=1.0,
                                           used_sigmoid_actFun=False))
    ref = dice_loss_ref(x, y, smooth=1.0, used_sigmoid_actFun=False)
    assert jnp.allclose(loss, ref, atol=1e-2, rtol=0.0), (loss, ref)

    # 2) Ragged element count (not a multiple of 1024): exercises the
    #    wrapper-side tail path (no in-kernel masking needed).
    k3, k4 = jax.random.split(jax.random.fold_in(key, 1))
    x2 = jax.random.uniform(k3, (2, 3, 15, 17), dtype=jnp.float32)
    y2 = (jax.random.uniform(k4, (2, 3, 15, 17)) > 0.5).astype(jnp.float32)
    loss2 = jax.block_until_ready(dice_loss(x2, y2, smooth=1.0,
                                            used_sigmoid_actFun=True))
    ref2 = dice_loss_ref(x2, y2, smooth=1.0, used_sigmoid_actFun=True)
    assert jnp.allclose(loss2, ref2, atol=1e-5, rtol=1e-5), (loss2, ref2)

    # 3) Multi-step reduction (small tile override => several grid steps per
    #    split), even block count: fast path only, no masking/phantom.
    k5, k6 = jax.random.split(jax.random.fold_in(key, 2))
    x3 = jax.random.uniform(k5, (4, 4, 64, 64), dtype=jnp.float32)
    y3 = (jax.random.uniform(k6, (4, 4, 64, 64)) > 0.5).astype(jnp.float32)
    loss3 = jax.block_until_ready(dice_loss(x3, y3, smooth=1.0,
                                            used_sigmoid_actFun=True,
                                            _max_tile_rows=64))
    ref3 = dice_loss_ref(x3, y3, smooth=1.0, used_sigmoid_actFun=True)
    assert jnp.allclose(loss3, ref3, atol=1e-5, rtol=1e-5), (loss3, ref3)

    # 4) Partial last block + phantom trailing block (odd block count):
    #    exercises the masked-last-block and skip-phantom branches.
    k7, k8 = jax.random.split(jax.random.fold_in(key, 3))
    x4 = jax.random.uniform(k7, (4, 4, 64, 65), dtype=jnp.float32)
    y4 = (jax.random.uniform(k8, (4, 4, 64, 65)) > 0.5).astype(jnp.float32)
    loss4 = jax.block_until_ready(dice_loss(x4, y4, smooth=1.0,
                                            used_sigmoid_actFun=True,
                                            _max_tile_rows=48))
    ref4 = dice_loss_ref(x4, y4, smooth=1.0, used_sigmoid_actFun=True)
    assert jnp.allclose(loss4, ref4, atol=1e-5, rtol=1e-5), (loss4, ref4)

    # 5) Narrow dtypes straight from HBM (bf16 preds + bf16 labels): BlockSpecs
    #    respect the (16, 128) multiple; the kernel upcasts in-register.
    k9, k10 = jax.random.split(jax.random.fold_in(key, 4))
    x5 = jax.random.uniform(k9, (2, 4, 16, 16), dtype=jnp.float32).astype(jnp.bfloat16)
    y5 = (jax.random.uniform(k10, (2, 4, 16, 16)) > 0.5).astype(jnp.bfloat16)
    loss5 = jax.block_until_ready(dice_loss(x5, y5, smooth=1.0,
                                            used_sigmoid_actFun=True))
    ref5 = dice_loss_ref(x5, y5, smooth=1.0, used_sigmoid_actFun=True)
    assert jnp.allclose(loss5, ref5, atol=1e-4, rtol=1e-4), (loss5, ref5)

    print("KERNEL_OK")
</pallas_src>

<mosaic_0001>
module attributes {stable_mosaic.version = 11 : i64} {
  func.func @_dice_kernel(%arg0: i32, %arg1: i32, %arg2: memref<16x128xf32, #tpu.memory_space<vmem>>, %arg3: memref<16x128xf32, #tpu.memory_space<vmem>>, %arg4: memref<1x2x8x128xf32, #tpu.memory_space<vmem>>) attributes {dimension_semantics = [#tpu.dimension_semantics<parallel>, #tpu.dimension_semantics<arbitrary>], iteration_bounds = array<i64: 1, 1>, scalar_prefetch = 0 : i64, scratch_operands = 0 : i64, tpu.core_type = #tpu.core_type<tc>, window_params = [{transform_indices = @transform_0, window_bounds = array<i64: 16, 128>}, {transform_indices = @transform_1, window_bounds = array<i64: 16, 128>}, {transform_indices = @transform_2, window_bounds = array<i64: 1, 2, 8, 128>}]} {
    %c0_i32 = arith.constant 0 : i32
    %0 = arith.cmpi eq, %arg1, %c0_i32 : i32
    %1 = arith.extui %0 : i1 to i32
    %c0_i32_0 = arith.constant 0 : i32
    %2 = arith.cmpi ne, %1, %c0_i32_0 : i32
    scf.if %2 {
      %cst_22 = arith.constant 0.000000e+00 : f32
      %29 = vector.broadcast %cst_22 : f32 to vector<1x2x8x128xf32>
      %c0_23 = arith.constant 0 : index
      %c0_24 = arith.constant 0 : index
      %c0_25 = arith.constant 0 : index
      %c0_26 = arith.constant 0 : index
      %30 = vector.load %arg4[%c0_23, %c0_24, %c0_25, %c0_26] : memref<1x2x8x128xf32, #tpu.memory_space<vmem>>, vector<1x2x8x128xf32>
      tpu.vector_store %arg4[%c0_23, %c0_24, %c0_25, %c0_26], %29 {strides = array<i32>} : memref<1x2x8x128xf32, #tpu.memory_space<vmem>>, vector<1x2x8x128xf32>,
    } else {
    }
    %c0 = arith.constant 0 : index
    %c0_1 = arith.constant 0 : index
    %3 = vector.load %arg2[%c0, %c0_1] : memref<16x128xf32, #tpu.memory_space<vmem>>, vector<16x128xf32>
    %c0_2 = arith.constant 0 : index
    %c0_3 = arith.constant 0 : index
    %4 = vector.load %arg3[%c0_2, %c0_3] : memref<16x128xf32, #tpu.memory_space<vmem>>, vector<16x128xf32>
    %cst = arith.constant 0.000000e+00 : f32
    %5 = vector.broadcast %cst : f32 to vector<16x128xf32>
    %6 = arith.subf %5, %3 : vector<16x128xf32>
    %7 = math.exp %6 : vector<16x128xf32>
    %cst_4 = arith.constant 1.000000e+00 : f32
    %8 = vector.broadcast %cst_4 : f32 to vector<16x128xf32>
    %9 = arith.addf %8, %7 : vector<16x128xf32>
    %10 = tpu.reciprocal %9 {approx = true} : vector<16x128xf32> -> vector<16x128xf32>
    %c0_5 = arith.constant 0 : index
    %c0_6 = arith.constant 0 : index
    %c0_7 = arith.constant 0 : index
    %c0_8 = arith.constant 0 : index
    %11 = vector.load %arg4[%c0_5, %c0_6, %c0_7, %c0_8] : memref<1x2x8x128xf32, #tpu.memory_space<vmem>>, vector<1x1x8x128xf32>
    %12 = vector.shape_cast %11 : vector<1x1x8x128xf32> to vector<8x128xf32>
    %13 = arith.mulf %10, %4 : vector<16x128xf32>
    %14 = vector.shape_cast %13 : vector<16x128xf32> to vector<2x8x128xf32>
    %cst_9 = arith.constant dense<0.000000e+00> : vector<8x128xf32>
    %15 = vector.multi_reduction <add>, %14, %cst_9 [0] : vector<2x8x128xf32> to vector<8x128xf32>
    %16 = arith.addf %12, %15 : vector<8x128xf32>
    %c0_10 = arith.constant 0 : index
    %c0_11 = arith.constant 0 : index
    %c0_12 = arith.constant 0 : index
    %c0_13 = arith.constant 0 : index
    %17 = vector.load %arg4[%c0_10, %c0_11, %c0_12, %c0_13] : memref<1x2x8x128xf32, #tpu.memory_space<vmem>>, vector<1x1x8x128xf32>
    %18 = vector.shape_cast %17 : vector<1x1x8x128xf32> to vector<8x128xf32>
    %19 = vector.shape_cast %16 : vector<8x128xf32> to vector<1x1x8x128xf32>
    tpu.vector_store %arg4[%c0_10, %c0_11, %c0_12, %c0_13], %19 {strides = array<i32>} : memref<1x2x8x128xf32, #tpu.memory_space<vmem>>, vector<1x1x8x128xf32>,
    %c0_14 = arith.constant 0 : index
    %c1 = arith.constant 1 : index
    %c0_15 = arith.constant 0 : index
    %c0_16 = arith.constant 0 : index
    %20 = vector.load %arg4[%c0_14, %c1, %c0_15, %c0_16] : memref<1x2x8x128xf32, #tpu.memory_space<vmem>>, vector<1x1x8x128xf32>
    %21 = vector.shape_cast %20 : vector<1x1x8x128xf32> to vector<8x128xf32>
    %22 = arith.addf %10, %4 : vector<16x128xf32>
    %23 = vector.shape_cast %22 : vector<16x128xf32> to vector<2x8x128xf32>
    %cst_17 = arith.constant dense<0.000000e+00> : vector<8x128xf32>
    %24 = vector.multi_reduction <add>, %23, %cst_17 [0] : vector<2x8x128xf32> to vector<8x128xf32>
    %25 = arith.addf %21, %24 : vector<8x128xf32>
    %c0_18 = arith.constant 0 : index
    %c1_19 = arith.constant 1 : index
    %c0_20 = arith.constant 0 : index
    %c0_21 = arith.constant 0 : index
    %26 = vector.load %arg4[%c0_18, %c1_19, %c0_20, %c0_21] : memref<1x2x8x128xf32, #tpu.memory_space<vmem>>, vector<1x1x8x128xf32>
    %27 = vector.shape_cast %26 : vector<1x1x8x128xf32> to vector<8x128xf32>
    %28 = vector.shape_cast %25 : vector<8x128xf32> to vector<1x1x8x128xf32>
    tpu.vector_store %arg4[%c0_18, %c1_19, %c0_20, %c0_21], %28 {strides = array<i32>} : memref<1x2x8x128xf32, #tpu.memory_space<vmem>>, vector<1x1x8x128xf32>,
    return
  }
  func.func @transform_0(%arg0: i32, %arg1: i32) -> (i32, i32) {
    %c1_i32 = arith.constant 1 : i32
    %0 = arith.muli %arg1, %c1_i32 : i32
    %1 = arith.addi %0, %arg0 : i32
    %c0_i32 = arith.constant 0 : i32
    %c0_i32_0 = arith.constant 0 : i32
    return %1, %c0_i32 : i32, i32
  }
  func.func @transform_1(%arg0: i32, %arg1: i32) -> (i32, i32) {
    %c1_i32 = arith.constant 1 : i32
    %0 = arith.muli %arg1, %c1_i32 : i32
    %1 = arith.addi %0, %arg0 : i32
    %c0_i32 = arith.constant 0 : i32
    %c0_i32_0 = arith.constant 0 : i32
    return %1, %c0_i32 : i32, i32
  }
  func.func @transform_2(%arg0: i32, %arg1: i32) -> (i32, i32, i32, i32) {
    %c0_i32 = arith.constant 0 : i32
    %c0_i32_0 = arith.constant 0 : i32
    %c0_i32_1 = arith.constant 0 : i32
    %c0_i32_2 = arith.constant 0 : i32
    return %arg0, %c0_i32, %c0_i32_0, %c0_i32_1 : i32, i32, i32, i32
  }
}

</mosaic_0001>

<bundles_post_ra>
// kernel: tpu_custom_call.1
= control target key start
LH: loop header
LB: loop body
LE: loop exit
PB: predicated region body
PF: predicated region fallthrough
CT: control target
= control target key end

     0   :  { %7 = vsyncpa [#allocation3], 0  ;;  %s221_s0 = inlined_call_operand.hbm [shape: f32[16,128], index: 0, kind: input, shape index: {}]   ;;  %s222_s1 = inlined_call_operand.hbm [shape: f32[16,128], index: 1, kind: input, shape index: {}]   ;;  %s223_s2 = inlined_call_operand.hbm [shape: f32[1,2,8,128], index: 2, kind: output, shape index: {}]  }
   0x1   :  { %8 = vsyncpa [#allocation6], 0 }
   0x2   :  { %9 = vsyncpa [#allocation4], 0  ;;  %s183_s9 = smov [#allocation2]  }
   0x3   :  { %s19_s10 = sshll.u32 %s183_s9, 4  ;;  %s20_s10 = int_to_ptr.vmem [resolvable:$true] %s19_s10 }
   0x4   :  { %s125_s11 = scalar_lea.vmem %s20_s10, 256  ;;  %p130_p1 = scmp.lt.s32.totalorder %s20_s10, %s20_s10 }
   0x5   :  { %p126_p0 = scmp.ne.s32.totalorder %s20_s10, %s125_s11  ;;  %p131_p2 = scmp.lt.s32.totalorder %s125_s11, %s125_s11 }
   0x7   :  { %p132_p3 = por %p131_p2, %p130_p1 }
   0x9   :  { %p133_p4 = pnand %p132_p3, %p126_p0 }
   0xb   :  { %136 = shalt.err (!%p133_p4)
}
   0xc   :  { %s184_s12 = smov 128   ;;  %s185_s13 = smov 8  }
   0xd   :  { %25 = dma.hbm_to_vmem [thread:$0]  %s221_s0, 256, %s20_s10, [#allocation3], %s184_s12, %s184_s12, %s185_s13  }
   0xe   :  { %s186_s16 = smov [#allocation5]  }
   0xf   :  { %s35_s17 = sshll.u32 %s186_s16, 4  ;;  %s36_s17 = int_to_ptr.vmem [resolvable:$true] %s35_s17 }
  0x10   :  { %s145_s18 = scalar_lea.vmem %s36_s17, 256  ;;  %p150_p6 = scmp.lt.s32.totalorder %s36_s17, %s36_s17 }
  0x11   :  { %p146_p5 = scmp.ne.s32.totalorder %s36_s17, %s145_s18  ;;  %p151_p7 = scmp.lt.s32.totalorder %s145_s18, %s145_s18 }
  0x13   :  { %p152_p8 = por %p151_p7, %p150_p6 }
  0x15   :  { %p153_p9 = pnand %p152_p8, %p146_p5 }
  0x17   :  { %156 = shalt.err (!%p153_p9)
}
  0x18   :  { %41 = dma.hbm_to_vmem [thread:$0]  %s222_s1, 256, %s36_s17, [#allocation6], %s184_s12, %s184_s12, %s185_s13  }
  0x19   :  { %177 = dma.done.wait [#allocation3], 256  }
  0x1a   :  { %178 = vsyncadd [#allocation3], 4294967040 }
  0x1b   :  { %179 = dma.done.wait [#allocation6], 256  }
  0x1c   :  { %180 = vsyncadd [#allocation6], 4294967040  ;;  %v58_v0 = vld [vmem:[#allocation2] sm:$0xff]  ;;  %v59_v1 = vld [vmem:[#allocation2 + $0x8] sm:$0xff]  ;;  %s187_s0 = smov [#allocation7]  }
  0x1d   :  { %v62_v2 = vsub.f32 0.0, %v58_v0  ;;  %v63_v3 = vsub.f32 0.0, %v59_v1  ;;  %v60_v10 = vld [vmem:[#allocation5] sm:$0xff]  ;;  %v61_v11 = vld [vmem:[#allocation5 + $0x8] sm:$0xff]  ;;  %s90_s1 = sshll.u32 %s187_s0, 4  ;;  %s91_s1 = int_to_ptr.vmem [resolvable:$true] %s90_s1 }
  0x1e   :  { %s157_s21 = scalar_lea.vmem %s91_s1, 256  ;;  %p162_p11 = scmp.lt.s32.totalorder %s91_s1, %s91_s1 }
  0x1f   :  { %v64_v4 = vmul.f32 1.442695, %v62_v2  ;;  %v66_v5 = vmul.f32 1.442695, %v63_v3  ;;  %p158_p10 = scmp.ne.s32.totalorder %s91_s1, %s157_s21  ;;  %p163_p12 = scmp.lt.s32.totalorder %s157_s21, %s157_s21 }
  0x21   :  { %109 = vpow2.f32 %v64_v4  ;;  %p164_p13 = por %p163_p12, %p162_p11 }
  0x22   :  { %111 = vpow2.f32 %v66_v5 }
  0x23   :  { %p165_p0 = pnand %p164_p13, %p158_p10 }
  0x2e   :  { %v110_v6 = vpop.eup %109 }
  0x2f   :  { %v112_v7 = vpop.eup %111  ;;  %v68_v8 = vadd.f32 1.0, %v110_v6 }
  0x30   :  { %v69_v9 = vadd.f32 1.0, %v112_v7 }
  0x31   :  { %113 = vrcp.f32 %v68_v8 }
  0x32   :  { %115 = vrcp.f32 %v69_v9 }
  0x3e   :  { %v114_v12 = vpop.eup %113 }
  0x3f   :  { %v116_v13 = vpop.eup %115  ;;  %v73_v14 = vmul.f32 %v114_v12, %v60_v10  ;;  %v80_v15 = vadd.f32 %v114_v12, %v60_v10 }
  0x40   :  { %v74_v16 = vmul.f32 %v116_v13, %v61_v11  ;;  %v81_v17 = vadd.f32 %v116_v13, %v61_v11 }
  0x42   :  { %v75_v18 = vadd.f32 %v74_v16, %v73_v14  ;;  %v82_v19 = vadd.f32 %v81_v17, %v80_v15 }
  0x44   :  { %77 = vst [vmem:[#allocation7] sm:$0xff] %v75_v18  ;;  %84 = vst [vmem:[#allocation7 + $0x8] sm:$0xff] %v82_v19 }
  0x45   :  { %168 = shalt.err (!%p165_p0)
}
  0x46   :  { %96 = dma.vmem_to_hbm [thread:$0]  %s91_s1, 256, %s223_s2, [#allocation4], %s184_s12, %s184_s12, %s185_s13  }
  0x47   :  { %181 = dma.done.wait [#allocation4], 256  }
  0x48   :  { %182 = vsyncadd [#allocation4], 4294967040 }
  0x49   :  { %100 = vsyncpa [#allocation3], 1 }
  0x4a   :  { %101 = vsyncpa [#allocation6], 1 }
  0x4b   :  { %102 = vsyncpa [#allocation4], 1 }

</bundles_post_ra>
